<compile_context>
chip_gen: v5e
topology: v5e:2x2
jax: 0.10.0
libtpu: 0.0.40
codegen_flags: <defaults>
</compile_context>

<pallas_src>
import functools
import math

import jax
import jax.numpy as jnp
from jax import lax
from jax.experimental import pallas as pl
from jax.experimental.pallas import tpu as pltpu


# --------------------------------------------------------------------------
# Kernel 1: tiled, pipelined linear  y = x @ W^T + b   (bf16 MXU, f32 acc)
# --------------------------------------------------------------------------
def _linear_kernel(x_ref, w_ref, b_ref, o_ref, acc_ref):
    @pl.when(pl.program_id(2) == 0)
    def _():
        acc_ref[...] = jnp.zeros_like(acc_ref)

    acc_ref[...] += jnp.dot(
        x_ref[...].astype(jnp.bfloat16),
        w_ref[...].astype(jnp.bfloat16),
        preferred_element_type=jnp.float32)

    @pl.when(pl.program_id(2) == pl.num_programs(2) - 1)
    def _():
        o_ref[...] = (acc_ref[...] + b_ref[...]).astype(o_ref.dtype)


def _pick_tile(dim, target, align):
    """Largest tile <= target that divides `dim` and is `align`-aligned;
    falls back to the full dimension (always a legal block)."""
    if dim <= target:
        return dim
    t = target
    while t >= align:
        if dim % t == 0 and t % align == 0:
            return t
        t //= 2
    return dim


def linear(x2d, w_t, b, *, tm=512, tn=512, tk=512):
    """x2d: [M, K], w_t: [K, O] (pre-transposed), b: [O] -> [M, O]."""
    M, K = x2d.shape
    O = w_t.shape[1]
    tm = _pick_tile(M, tm, 16)    # 16-sublane aligned (bf16 packing)
    tn = _pick_tile(O, tn, 128)   # lane-aligned
    tk = _pick_tile(K, tk, 128)   # lane-aligned (last dim of x block)

    # Guard against a pathological full-dim fallback blowing up VMEM.
    est_bytes = 4 * (2 * tm * tk + 2 * tk * tn + 2 * tm * tn + tm * tn)
    if est_bytes > 100 * 1024 * 1024:
        raise ValueError(
            f"linear(): no aligned tiling found for (M,K,O)=({M},{K},{O}); "
            f"fallback block needs ~{est_bytes >> 20} MiB VMEM")

    grid = (M // tm, O // tn, K // tk)
    return pl.pallas_call(
        _linear_kernel,
        out_shape=jax.ShapeDtypeStruct((M, O), x2d.dtype),
        grid_spec=pltpu.PrefetchScalarGridSpec(
            num_scalar_prefetch=0,
            grid=grid,
            in_specs=[
                pl.BlockSpec((tm, tk), lambda i, j, k: (i, k)),
                pl.BlockSpec((tk, tn), lambda i, j, k: (k, j)),
                pl.BlockSpec((1, tn), lambda i, j, k: (0, j)),
            ],
            out_specs=pl.BlockSpec((tm, tn), lambda i, j, k: (i, j)),
            scratch_shapes=[pltpu.VMEM((tm, tn), jnp.float32)],
        ),
        compiler_params=pltpu.CompilerParams(
            dimension_semantics=("parallel", "parallel", "arbitrary"),
            vmem_limit_bytes=64 * 1024 * 1024),
    )(x2d, w_t, b.reshape(1, O))


# --------------------------------------------------------------------------
# Kernel 2: fused per-(batch, head) attention + output projection.
#   grid = (B, H); h is a reduction ("arbitrary") into a resident f32 [S, E]
#   accumulator that already carries the fc projection.
#   Inputs per step:
#     qkv_ref : [1, S, 1, 3, D]  (head-grouped qkv; scale + pe pre-folded)
#     wfc_ref : [1, D, E]        (head h's slice of fc weight)
#     bfc_ref : [1, E]
#   Output (written at last head): o_ref [1, S, E]  (lane-dense slab)
# --------------------------------------------------------------------------
def _attn_fc_kernel(qkv_ref, wfc_ref, bfc_ref, o_ref, acc_ref):
    h = pl.program_id(1)

    @pl.when(h == 0)
    def _():
        acc_ref[...] = jnp.zeros_like(acc_ref)

    # Per-head ref loads (no full-slab materialization).
    q = qkv_ref[0, :, 0, 0, :].astype(jnp.bfloat16)    # [S, D]
    k = qkv_ref[0, :, 0, 1, :].astype(jnp.bfloat16)    # [S, D]
    v = qkv_ref[0, :, 0, 2, :].astype(jnp.bfloat16)    # [S, D]

    # scores = q @ k^T  (1/sqrt(D) already folded into q via the weights).
    s = lax.dot_general(q, k, (((1,), (1,)), ((), ())),
                        preferred_element_type=jnp.float32)          # [S, S]
    m = jnp.max(s, axis=-1, keepdims=True)
    e = jnp.exp(s - m)
    l = jnp.sum(e, axis=-1, keepdims=True)

    # Un-normalized PV matmul; normalize the small [S, D] result.
    pv = lax.dot_general(e.astype(jnp.bfloat16), v, (((1,), (0,)), ((), ())),
                         preferred_element_type=jnp.float32)          # [S, D]
    head = (pv * pl.reciprocal(l, approx=True)).astype(jnp.bfloat16)  # [S, D]

    # Fused fc: accumulate head contribution  head @ w_fc[hD:(h+1)D, :].
    acc_ref[...] += lax.dot_general(
        head, wfc_ref[0].astype(jnp.bfloat16), (((1,), (0,)), ((), ())),
        preferred_element_type=jnp.float32)                           # [S, E]

    @pl.when(h == pl.num_programs(1) - 1)
    def _():
        o_ref[0] = (acc_ref[...] + bfc_ref[...]).astype(o_ref.dtype)


def attention_fc(qkv, w_fc_h, b_fc):
    """qkv: [B, S, H, 3, D] (head-grouped), w_fc_h: [H, D, E], b_fc: [1, E]
    -> module output [B, S, E]."""
    B, S, H, _, D = qkv.shape
    E = H * D
    return pl.pallas_call(
        _attn_fc_kernel,
        out_shape=jax.ShapeDtypeStruct((B, S, E), qkv.dtype),
        grid_spec=pltpu.PrefetchScalarGridSpec(
            num_scalar_prefetch=0,
            grid=(B, H),
            in_specs=[
                pl.BlockSpec((1, S, 1, 3, D), lambda b, h: (b, 0, h, 0, 0)),
                pl.BlockSpec((1, D, E), lambda b, h: (h, 0, 0)),
                pl.BlockSpec((1, E), lambda b, h: (0, 0)),
            ],
            out_specs=pl.BlockSpec((1, S, E), lambda b, h: (b, 0, 0)),
            scratch_shapes=[pltpu.VMEM((S, E), jnp.float32)],
        ),
        compiler_params=pltpu.CompilerParams(
            dimension_semantics=("parallel", "arbitrary"),
            vmem_limit_bytes=64 * 1024 * 1024),
    )(qkv, w_fc_h, b_fc)


# --------------------------------------------------------------------------
# Parameter construction (deterministic, mimics module __init__ shapes)
# --------------------------------------------------------------------------
def make_params(key, embedding_size, nheads, max_seq_len):
    E = embedding_size
    k1, k2, k3, k4 = jax.random.split(key, 4)
    bound = 1.0 / math.sqrt(E)
    params = {
        "nheads": nheads,
        # stored pre-transposed: [in, out]
        "w_qkv_t": jax.random.uniform(k1, (E, 3 * E), jnp.float32, -bound, bound),
        "b_qkv": jax.random.uniform(k2, (3 * E,), jnp.float32, -bound, bound),
        "w_fc_t": jax.random.uniform(k3, (E, E), jnp.float32, -bound, bound),
        "b_fc": jax.random.uniform(k4, (E,), jnp.float32, -bound, bound),
    }
    # PositionalEncoding buffer, exactly as in the PyTorch module.
    position = jnp.arange(max_seq_len, dtype=jnp.float32)[:, None]
    div_term = jnp.exp(jnp.arange(0, E, 2, dtype=jnp.float32)
                       * (-math.log(10000.0) / E))
    pe = jnp.zeros((max_seq_len, E), jnp.float32)
    pe = pe.at[:, 0::2].set(jnp.sin(position * div_term))
    pe = pe.at[:, 1::2].set(jnp.cos(position * div_term))
    params["pe"] = pe
    return params


# --------------------------------------------------------------------------
# Full forward (weight-side prep in plain JAX, hot paths in Pallas kernels)
# --------------------------------------------------------------------------
def attention_module_forward(x, params):
    B, S, E = x.shape
    H = params["nheads"]
    assert E % H == 0, "embedding_size must be divisible by nheads"
    D = E // H
    scale = 1.0 / math.sqrt(D)

    # --- one-time, weight-sized prep (no activation transposes) ------------
    # pe[S-1] (single row, broadcast over positions, added to q and k only)
    # folded into the qkv bias.
    pe_row = params["pe"][S - 1]
    b_eff = params["b_qkv"] + jnp.concatenate(
        [pe_row, pe_row, jnp.zeros_like(pe_row)])
    # Fold 1/sqrt(D) into the q columns (weights + bias, incl. folded pe).
    col_scale = jnp.concatenate(
        [jnp.full((E,), scale, jnp.float32), jnp.ones((2 * E,), jnp.float32)])
    w_eff = params["w_qkv_t"] * col_scale
    b_eff = b_eff * col_scale
    # Regroup qkv columns from (q|k|v, head, d) to (head, q|k|v, d) so each
    # head's q,k,v are contiguous -> static per-head BlockSpecs downstream.
    w_g = w_eff.reshape(E, 3, H, D).transpose(0, 2, 1, 3).reshape(E, 3 * E)
    b_g = b_eff.reshape(3, H, D).transpose(1, 0, 2).reshape(3 * E)
    # fc weight viewed per head (free reshape: row index = h*D + d).
    w_fc_h = params["w_fc_t"].reshape(H, D, E)
    b_fc = params["b_fc"].reshape(1, E)

    # qkv projection (tiled Pallas linear kernel, bf16 MXU / f32 acc).
    qkv = linear(x.reshape(B * S, E), w_g, b_g)        # [B*S, 3E] head-grouped
    qkv = qkv.reshape(B, S, H, 3, D)                   # free reshape

    # Fused multi-head attention + output projection.
    return attention_fc(qkv, w_fc_h, b_fc)             # [B, S, E]


# --------------------------------------------------------------------------
# Pure-JAX reference (mirrors the PyTorch forward) for a sanity check
# --------------------------------------------------------------------------
def reference_forward(x, params):
    B, S, E = x.shape
    H = params["nheads"]
    D = E // H
    qkv = x @ params["w_qkv_t"] + params["b_qkv"]
    xq, xk, xv = jnp.split(qkv, 3, axis=-1)
    pe_row = params["pe"][S - 1]
    xq = xq + pe_row
    xk = xk + pe_row

    def to_heads(t):
        return jnp.transpose(t.reshape(B, S, H, D), (0, 2, 1, 3))

    xq, xk, xv = to_heads(xq), to_heads(xk), to_heads(xv)
    scores = jnp.einsum("bhqd,bhkd->bhqk", xq, xk) * (1.0 / math.sqrt(D))
    scores = jax.nn.softmax(scores, axis=-1)
    out = jnp.einsum("bhqk,bhkd->bhqd", scores, xv)
    out = jnp.transpose(out, (0, 2, 1, 3)).reshape(B, S, E)
    return out @ params["w_fc_t"] + params["b_fc"]


if __name__ == "__main__":
    B, S, E, H, MAX_LEN = 2, 8, 32, 4, 64

    key = jax.random.PRNGKey(0)
    kx, kp = jax.random.split(key)
    x = jax.random.normal(kx, (B, S, E), jnp.float32)
    params = make_params(kp, E, H, MAX_LEN)

    out = attention_module_forward(x, params)
    out = jax.block_until_ready(out)

    ref = reference_forward(x, params)
    assert out.shape == (B, S, E)
    max_err = float(jnp.max(jnp.abs(out - ref)))
    # bf16 MXU operands + approx reciprocal -> loosened tolerance vs f32 ref.
    assert jnp.allclose(out, ref, atol=5e-2, rtol=5e-2), (
        f"mismatch vs reference (max abs err {max_err})")

    print("KERNEL_OK")
</pallas_src>

<mosaic_0001>
module attributes {stable_mosaic.version = 11 : i64} {
  func.func @_linear_kernel(%arg0: i32, %arg1: i32, %arg2: i32, %arg3: memref<16x32xf32, #tpu.memory_space<vmem>>, %arg4: memref<32x96xf32, #tpu.memory_space<vmem>>, %arg5: memref<1x96xf32, #tpu.memory_space<vmem>>, %arg6: memref<16x96xf32, #tpu.memory_space<vmem>>, %arg7: memref<16x96xf32, #tpu.memory_space<vmem>>) attributes {dimension_semantics = [#tpu.dimension_semantics<parallel>, #tpu.dimension_semantics<parallel>, #tpu.dimension_semantics<arbitrary>], iteration_bounds = array<i64: 1, 1, 1>, scalar_prefetch = 0 : i64, scratch_operands = 1 : i64, tpu.core_type = #tpu.core_type<tc>, window_params = [{transform_indices = @transform_0, window_bounds = array<i64: 16, 32>}, {transform_indices = @transform_1, window_bounds = array<i64: 32, 96>}, {transform_indices = @transform_2, window_bounds = array<i64: 1, 96>}, {transform_indices = @transform_3, window_bounds = array<i64: 16, 96>}]} {
    %c0_i32 = arith.constant 0 : i32
    %0 = arith.cmpi eq, %arg2, %c0_i32 : i32
    %1 = arith.extui %0 : i1 to i32
    %c0_i32_0 = arith.constant 0 : i32
    %2 = arith.cmpi ne, %1, %c0_i32_0 : i32
    scf.if %2 {
      %cst_10 = arith.constant 0.000000e+00 : f32
      %14 = vector.broadcast %cst_10 : f32 to vector<16x96xf32>
      %c0_11 = arith.constant 0 : index
      %c0_12 = arith.constant 0 : index
      %15 = vector.load %arg7[%c0_11, %c0_12] : memref<16x96xf32, #tpu.memory_space<vmem>>, vector<16x96xf32>
      tpu.vector_store %arg7[%c0_11, %c0_12], %14 {strides = array<i32>} : memref<16x96xf32, #tpu.memory_space<vmem>>, vector<16x96xf32>,
    } else {
    }
    %c0 = arith.constant 0 : index
    %c0_1 = arith.constant 0 : index
    %3 = vector.load %arg7[%c0, %c0_1] : memref<16x96xf32, #tpu.memory_space<vmem>>, vector<16x96xf32>
    %c0_2 = arith.constant 0 : index
    %c0_3 = arith.constant 0 : index
    %4 = vector.load %arg3[%c0_2, %c0_3] : memref<16x32xf32, #tpu.memory_space<vmem>>, vector<16x32xf32>
    %5 = arith.truncf %4 : vector<16x32xf32> to vector<16x32xbf16>
    %c0_4 = arith.constant 0 : index
    %c0_5 = arith.constant 0 : index
    %6 = vector.load %arg4[%c0_4, %c0_5] : memref<32x96xf32, #tpu.memory_space<vmem>>, vector<32x96xf32>
    %7 = arith.truncf %6 : vector<32x96xf32> to vector<32x96xbf16>
    %cst = arith.constant dense<0.000000e+00> : vector<16x96xf32>
    %8 = tpu.matmul %5, %7, %cst {dimension_numbers = #tpu.dot_dimension_numbers<[1], [0], [0], [1], [0, 0, 1, 1], [], []>} : vector<16x32xbf16>, vector<32x96xbf16>, vector<16x96xf32> -> vector<16x96xf32>
    %9 = arith.addf %3, %8 : vector<16x96xf32>
    %c0_6 = arith.constant 0 : index
    %c0_7 = arith.constant 0 : index
    %10 = vector.load %arg7[%c0_6, %c0_7] : memref<16x96xf32, #tpu.memory_space<vmem>>, vector<16x96xf32>
    tpu.vector_store %arg7[%c0_6, %c0_7], %9 {strides = array<i32>} : memref<16x96xf32, #tpu.memory_space<vmem>>, vector<16x96xf32>,
    %c0_i32_8 = arith.constant 0 : i32
    %11 = arith.cmpi eq, %arg2, %c0_i32_8 : i32
    %12 = arith.extui %11 : i1 to i32
    %c0_i32_9 = arith.constant 0 : i32
    %13 = arith.cmpi ne, %12, %c0_i32_9 : i32
    scf.if %13 {
      %c0_10 = arith.constant 0 : index
      %c0_11 = arith.constant 0 : index
      %14 = vector.load %arg7[%c0_10, %c0_11] : memref<16x96xf32, #tpu.memory_space<vmem>>, vector<16x96xf32>
      %c0_12 = arith.constant 0 : index
      %c0_13 = arith.constant 0 : index
      %15 = vector.load %arg5[%c0_12, %c0_13] : memref<1x96xf32, #tpu.memory_space<vmem>>, vector<1x96xf32>
      %16 = vector.broadcast %15 : vector<1x96xf32> to vector<16x96xf32>
      %17 = arith.addf %14, %16 : vector<16x96xf32>
      %c0_14 = arith.constant 0 : index
      %c0_15 = arith.constant 0 : index
      %18 = vector.load %arg6[%c0_14, %c0_15] : memref<16x96xf32, #tpu.memory_space<vmem>>, vector<16x96xf32>
      tpu.vector_store %arg6[%c0_14, %c0_15], %17 {strides = array<i32>} : memref<16x96xf32, #tpu.memory_space<vmem>>, vector<16x96xf32>,
    } else {
    }
    return
  }
  func.func @transform_0(%arg0: i32, %arg1: i32, %arg2: i32) -> (i32, i32) {
    %c0_i32 = arith.constant 0 : i32
    return %arg0, %arg2 : i32, i32
  }
  func.func @transform_1(%arg0: i32, %arg1: i32, %arg2: i32) -> (i32, i32) {
    %c0_i32 = arith.constant 0 : i32
    return %arg2, %arg1 : i32, i32
  }
  func.func @transform_2(%arg0: i32, %arg1: i32, %arg2: i32) -> (i32, i32) {
    %c0_i32 = arith.constant 0 : i32
    %c0_i32_0 = arith.constant 0 : i32
    return %c0_i32, %arg1 : i32, i32
  }
  func.func @transform_3(%arg0: i32, %arg1: i32, %arg2: i32) -> (i32, i32) {
    %c0_i32 = arith.constant 0 : i32
    return %arg0, %arg1 : i32, i32
  }
}

</mosaic_0001>

<bundles_post_ra>
// kernel: tpu_custom_call.1
= control target key start
LH: loop header
LB: loop body
LE: loop exit
PB: predicated region body
PF: predicated region fallthrough
CT: control target
= control target key end

     0   :  { %8 = vsyncpa [#allocation4], 0  ;;  %s261_s0 = inlined_call_operand.hbm [shape: f32[16,32], index: 0, kind: input, shape index: {}]   ;;  %s262_s1 = inlined_call_operand.hbm [shape: f32[32,96], index: 1, kind: input, shape index: {}]   ;;  %s263_s2 = inlined_call_operand.vmem [shape: f32[1,96], index: 2, kind: input, shape index: {}]   ;;  %s264_s3 = inlined_call_operand.hbm [shape: f32[16,96], index: 3, kind: output, shape index: {}]  }
   0x1   :  { %9 = vsyncpa [#allocation7], 0 }
   0x2   :  { %10 = vsyncpa [#allocation5], 0  ;;  %s15_s14 = sshll.u32 %s261_s0, 4  ;;  %s208_s15 = smov [#allocation3]   ;;  %s16_s14 = int_to_ptr.hbm [resolvable:$true] %s15_s14 }
   0x3   :  { %s17_s16 = sshll.u32 %s208_s15, 4  ;;  %s28_s19 = sshll.u32 %s262_s1, 4  ;;  %s18_s16 = int_to_ptr.vmem [resolvable:$true] %s17_s16  ;;  %s29_s19 = int_to_ptr.hbm [resolvable:$true] %s28_s19 }
   0x4   :  { %s209_s20 = smov 128   ;;  %s210_s21 = smov 8  }
   0x5   :  { %23 = dma.hbm_to_vmem [thread:$0]  %s16_s14, 256, %s18_s16, [#allocation4], %s209_s20, %s209_s20, %s210_s21  }
   0x6   :  { %s211_s22 = smov [#allocation6]  }
   0x7   :  { %s30_s23 = sshll.u32 %s211_s22, 4  ;;  %s31_s23 = int_to_ptr.vmem [resolvable:$true] %s30_s23 }
   0x8   :  { %36 = dma.hbm_to_vmem [thread:$0]  %s29_s19, 512, %s31_s23, [#allocation7], %s209_s20, %s209_s20, %s210_s21  }
   0x9   :  { %202 = dma.done.wait [#allocation4], 256  }
   0xa   :  { %203 = vsyncadd [#allocation4], 4294967040 }
   0xb   :  { %204 = dma.done.wait [#allocation7], 512  }
   0xc   :  { %205 = vsyncadd [#allocation7], 4294966784  ;;  %vm52_vm0 = vcmask 785408   ;;  %v212_v0 = vmov 0.0   ;;  %v62_v1 = vld [vmem:[#allocation6 + $0x10] sm:$0xff]  ;;  %v63_v2 = vld [vmem:[#allocation6 + $0x18] sm:$0xff] }
   0xd   :  { %53 = vst.msk [vmem:[#allocation2] sm:$0xff] %vm52_vm0, %v212_v0  ;;  %v60_v3 = vld [vmem:[#allocation6] sm:$0xff]  ;;  %v65_v4 = vpack.c.bf16 %v63_v2, %v62_v1  ;;  %v61_v5 = vld [vmem:[#allocation6 + $0x8] sm:$0xff]  ;;  %v57_v7 = vld [vmem:[#allocation3] sm:$0xff]  ;;  %vm66_vm1 = vcmask 261120   ;;  %s213_s24 = smov [#allocation8]  }
   0xe   :  { %54 = vst.msk [vmem:[#allocation2 + $0x8] sm:$0xff] %vm52_vm0, %v212_v0  ;;  %v64_v6 = vpack.c.bf16 %v61_v5, %v60_v3  ;;  %v58_v8 = vld [vmem:[#allocation3 + $0x8] sm:$0xff]  ;;  %v129_v14 = vld [vmem:[%s263_s2] ss:$0 sm:$0xff]  ;;  %s106_s25 = sshll.u32 %s213_s24, 4  ;;  %s108_s28 = sshll.u32 %s264_s3, 4  ;;  %s107_s25 = int_to_ptr.vmem [resolvable:$true] %s106_s25  ;;  %s109_s28 = int_to_ptr.hbm [resolvable:$true] %s108_s28 }
   0xf   :  { %76 = vmatpush.bf16.msra.mxu0 %v65_v4  ;;  %v59_v9 = vpack.c.bf16 %v58_v8, %v57_v7 }
  0x13   :  { %77 = vmatpush.bf16.msra.mxu0 %v64_v6 }
  0x14   :  { %v55_v10 = vld [vmem:[#allocation2] sm:$0xff] }
  0x15   :  { %v56_v13 = vld [vmem:[#allocation2 + $0x8] sm:$0xff] }
  0x16   :  { %122 = vmatmul.msk.bf16.vlgmr.msra.gmra.mxu0 %vm66_vm1, %v59_v9 }
  0x93   :  { %v79_v11 = vpop.f32.mrf.mxu0 }
  0x94   :  { %v84_v12 = vadd.f32 %v79_v11, %v55_v10 }
  0x96   :  { %87 = vst.msk [vmem:[#allocation2] sm:$0xff] %vm52_vm0, %v84_v12 }
  0x9b   :  { %v81_v15 = vpop.f32.mrf.mxu0 }
  0x9c   :  { %v85_v16 = vadd.f32 %v81_v15, %v56_v13 }
  0x9d   :  { %v92_v17 = vld [vmem:[#allocation2] sm:$0xff] }
  0x9e   :  { %88 = vst.msk [vmem:[#allocation2 + $0x8] sm:$0xff] %vm52_vm0, %v85_v16  ;;  %v98_v18 = vadd.f32 %v129_v14, %v92_v17 }
  0xa0   :  { %100 = vst.msk [vmem:[#allocation8] sm:$0xff] %vm52_vm0, %v98_v18 }
  0xa5   :  { %v93_v19 = vld [vmem:[#allocation2 + $0x8] sm:$0xff] }
  0xa6   :  { %v99_v20 = vadd.f32 %v129_v14, %v93_v19 }
  0xa8   :  { %101 = vst.msk [vmem:[#allocation8 + $0x8] sm:$0xff] %vm52_vm0, %v99_v20 }
  0xa9   :  { %114 = dma.vmem_to_hbm [thread:$0]  %s107_s25, 256, %s109_s28, [#allocation5], %s209_s20, %s209_s20, %s210_s21  }
  0xaa   :  { %206 = dma.done.wait [#allocation5], 256  }
  0xab   :  { %207 = vsyncadd [#allocation5], 4294967040 }
  0xac   :  { %119 = vsyncpa [#allocation4], 1 }
  0xad   :  { %120 = vsyncpa [#allocation7], 1 }
  0xae   :  { %121 = vsyncpa [#allocation5], 1 }

</bundles_post_ra>
